<compile_context>
chip_gen: v5e
topology: v5e:2x2
jax: 0.10.0
libtpu: 0.0.40
codegen_flags: <defaults>
</compile_context>

<pallas_src>
import functools

import jax
import jax.numpy as jnp
from jax import lax
from jax.experimental import pallas as pl
from jax.experimental.pallas import tpu as pltpu

EPS = 1e-6
_LANE = 128


def _elementwise_loss(diff, loss_type):
    if loss_type == "L1Loss":
        return jnp.abs(diff)
    elif loss_type == "SmoothL1Loss":
        # PyTorch SmoothL1Loss default beta=1.0
        a = jnp.abs(diff)
        return jnp.where(a < 1.0, 0.5 * a * a, a - 0.5)
    elif loss_type == "MSELoss":
        return diff * diff
    raise NotImplementedError(loss_type)


def _device_kind():
    try:
        return jax.devices()[0].device_kind.lower()
    except Exception:
        return ""


def _default_num_splits():
    # Dual-TensorCore / megacore parts benefit from a "parallel" leading axis
    # (both TCs' DMA engines pull concurrently).  Single-TC chips get 1 split.
    kind = _device_kind()
    if any(tag in kind for tag in ("v4", "v5p", "v7", "7x")):
        return 2
    return 1


def _vmem_tile_budget_bytes():
    # Double-buffered per-step tile budget.  v6e/v7x: 32 MiB default scoped
    # VMEM -> ~26 MiB of tiles; v5e (16 MiB default scoped) / unknown: ~11 MiB.
    kind = _device_kind()
    if any(tag in kind for tag in ("v6", "v7", "7x")):
        return 26 << 20
    return 11 << 20


def _round_up(x, m):
    return -(-x // m) * m


def _recon_loss_kernel(pred_ref, tgt_ref, mask_ref, out_ref, *,
                       loss_type, rows, tile_rows, chunk, tiles_per_split,
                       unroll):
    c = pl.program_id(0)   # split index ("parallel" axis -> megacore shard)
    j = pl.program_id(1)   # row-tile index within the split ("arbitrary")

    # out_ref is this split's resident (8, D) partial-sum slab (same block
    # index across the whole j axis), so it doubles as the accumulator.
    @pl.when(j == 0)
    def _():
        out_ref[...] = jnp.zeros_like(out_ref)

    tile_idx = c * tiles_per_split + j        # unclamped logical tile index
    base_row = tile_idx * tile_rows           # global row offset of this tile

    d = pred_ref.shape[1]
    n_chunks = tile_rows // chunk
    n_slabs = chunk // 8
    n_acc = 1 if n_slabs == 1 else 2          # independent accumulators

    def tile_partial(masked_tail):
        def body(k, accs):
            r0 = pl.multiple_of(k * chunk, chunk)
            p = pred_ref[pl.ds(r0, chunk), :].astype(jnp.float32)
            t = tgt_ref[pl.ds(r0, chunk), :].astype(jnp.float32)
            m = mask_ref[pl.ds(r0, chunk), :]                  # (chunk, 1) f32
            prod = (p - t) * m
            if masked_tail:
                # Tail / overhang rows (at or beyond `rows`) contribute nothing.
                # Select applied to the product: NaN-safe vs garbage OOB data.
                row_ids = (base_row + r0
                           + lax.broadcasted_iota(jnp.int32, (chunk, 1), 0))
                prod = jnp.where(row_ids < rows, prod, 0.0)
            l = _elementwise_loss(prod, loss_type)
            # Pairwise tree fold of the chunk's (8, d) slabs (log-depth chain),
            # then feed the surviving slabs into independent accumulators.
            slabs = [l[s * 8:(s + 1) * 8, :] for s in range(n_slabs)]
            while len(slabs) > n_acc:
                nxt = [slabs[i] + slabs[i + 1]
                       for i in range(0, len(slabs) - 1, 2)]
                if len(slabs) % 2:
                    nxt.append(slabs[-1])
                slabs = nxt
            return tuple(a + s for a, s in zip(accs, slabs))

        zeros = tuple(jnp.zeros((8, d), jnp.float32) for _ in range(n_acc))
        accs = lax.fori_loop(0, n_chunks, body, zeros, unroll=unroll)
        total = accs[0]
        for a in accs[1:]:
            total = total + a
        return total

    is_interior = (tile_idx + 1) * tile_rows <= rows   # no tail, not a duplicate
    has_valid_rows = base_row < rows                   # duplicated tiles: False

    @pl.when(is_interior)
    def _():
        out_ref[...] += tile_partial(False)            # fast path: no row select

    @pl.when(jnp.logical_and(jnp.logical_not(is_interior), has_valid_rows))
    def _():
        out_ref[...] += tile_partial(True)             # boundary tile only


def recon_loss(pred, target, mask, *, loss_type="MSELoss",
               tile_rows=None, num_splits=None):
    """pred, target: (B, S, D); mask: (B, S). Returns scalar f32 loss."""
    assert pred.shape == target.shape
    B, S, D = pred.shape
    rows = B * S

    pred2 = pred.reshape(rows, D)                  # native dtype, no upcast
    tgt2 = target.reshape(rows, D)
    mask2 = mask.reshape(rows, 1).astype(jnp.float32)

    # ---- inner chunk: power-of-two multiple of 8 rows, <= ~8192 elements ----
    chunk = 8
    while chunk * 2 * D <= 8192:
        chunk *= 2
    # Don't let the minimum block exceed the (sublane-rounded) row count.
    while chunk > max(8, _round_up(rows, 8)):
        chunk //= 2

    if tile_rows is not None:
        tile_rows = max(8, (int(tile_rows) // 8) * 8)
        while chunk > tile_rows:
            chunk //= 2
        tile_rows = max(chunk, (tile_rows // chunk) * chunk)

    # ---- VMEM accounting (lane-padded) --------------------------------------
    # Data blocks pad D up to 128 lanes; the (tile_rows, 1) f32 mask block pads
    # to a full 128-lane row (512 B/row) — previously unaccounted.
    d_pad = _round_up(D, _LANE)
    bytes_per_row = (d_pad * pred2.dtype.itemsize
                     + d_pad * tgt2.dtype.itemsize
                     + _LANE * 4)
    budget = _vmem_tile_budget_bytes()            # double-buffered tile budget
    max_rows = max(chunk, (budget // (2 * bytes_per_row)) // chunk * chunk)

    if tile_rows is None:
        tile_rows = max_rows                      # biggest tile the budget allows
    tile_rows = min(tile_rows, max_rows, _round_up(rows, chunk))
    tile_rows = max(chunk, (tile_rows // chunk) * chunk)

    n_chunks = tile_rows // chunk
    unroll = max(1, min(n_chunks, 4 if chunk * D <= 4096 else 2))

    total_tiles = -(-rows // tile_rows)
    if num_splits is None:
        num_splits = _default_num_splits()
    num_splits = max(1, min(int(num_splits), total_tiles))
    tiles_per_split = -(-total_tiles // num_splits)
    last_tile = total_tiles - 1

    def in_idx(c, j):
        # Clamp so the DMA never targets a fully out-of-range block; duplicated
        # tiles are skipped in-kernel (has_valid_rows == False).
        return (jnp.minimum(c * tiles_per_split + j, last_tile), 0)

    kernel = functools.partial(
        _recon_loss_kernel, loss_type=loss_type, rows=rows,
        tile_rows=tile_rows, chunk=chunk, tiles_per_split=tiles_per_split,
        unroll=unroll)

    # Explicit scoped-VMEM limit: double-buffered inputs + output slabs + slack.
    footprint = 2 * tile_rows * bytes_per_row + 2 * 8 * d_pad * 4
    vmem_limit = int(min(max(footprint + (6 << 20), 16 << 20), 56 << 20))

    partials = pl.pallas_call(
        kernel,
        out_shape=jax.ShapeDtypeStruct((num_splits * 8, D), jnp.float32),
        grid_spec=pltpu.PrefetchScalarGridSpec(
            num_scalar_prefetch=0,
            grid=(num_splits, tiles_per_split),
            in_specs=[
                pl.BlockSpec((tile_rows, D), in_idx),
                pl.BlockSpec((tile_rows, D), in_idx),
                pl.BlockSpec((tile_rows, 1), in_idx),
            ],
            out_specs=pl.BlockSpec((8, D), lambda c, j: (c, 0)),
        ),
        compiler_params=pltpu.CompilerParams(
            dimension_semantics=("parallel", "arbitrary"),
            vmem_limit_bytes=vmem_limit),
    )(pred2, tgt2, mask2)

    # Tiny final reductions in the wrapper (XLA): sum partial slabs, divide by
    # the expanded-mask sum, exactly as the PyTorch module does.
    loss_sum = jnp.sum(partials)
    denom = jnp.sum(mask2) * jnp.float32(D)
    return loss_sum / (denom + jnp.float32(EPS))


def recon_loss_ref(pred, target, mask, loss_type):
    """Plain-JAX reference mirroring the PyTorch module."""
    m = mask[..., None].astype(jnp.float32)
    m = jnp.broadcast_to(m, pred.shape)
    diff = pred * m - target * m
    l = _elementwise_loss(diff.astype(jnp.float32), loss_type)
    return jnp.sum(l) / (jnp.sum(m) + EPS)


if __name__ == "__main__":
    ok = True

    # Config 1: small shapes matching the module (B, S, D) f32 — single tile,
    # exercises the boundary (tail) path.
    B, S, D = 2, 8, 32
    k1, k2, k3 = jax.random.split(jax.random.PRNGKey(0), 3)
    pred = jax.random.normal(k1, (B, S, D), dtype=jnp.float32)
    target = jax.random.normal(k2, (B, S, D), dtype=jnp.float32)
    mask = (jax.random.uniform(k3, (B, S)) > 0.3).astype(jnp.float32)
    for loss_type in ("L1Loss", "SmoothL1Loss", "MSELoss"):
        out = jax.block_until_ready(recon_loss(pred, target, mask, loss_type=loss_type))
        ref = recon_loss_ref(pred, target, mask, loss_type)
        if not jnp.allclose(out, ref, rtol=1e-5, atol=1e-5):
            ok = False
            print(f"MISMATCH f32 {loss_type}: kernel={out} ref={ref}")

    # Config 2: bf16 inputs, ragged rows, odd tile count with num_splits=2 —
    # exercises interior fast path, tail path, and the duplicated-tile skip.
    B2, S2, D2 = 5, 19, 32
    k4, k5, k6 = jax.random.split(jax.random.PRNGKey(1), 3)
    pred2 = jax.random.normal(k4, (B2, S2, D2), dtype=jnp.float32).astype(jnp.bfloat16)
    target2 = jax.random.normal(k5, (B2, S2, D2), dtype=jnp.float32).astype(jnp.bfloat16)
    mask2 = (jax.random.uniform(k6, (B2, S2)) > 0.5).astype(jnp.float32)
    for loss_type in ("L1Loss", "SmoothL1Loss", "MSELoss"):
        out = jax.block_until_ready(
            recon_loss(pred2, target2, mask2, loss_type=loss_type,
                       tile_rows=32, num_splits=2))
        ref = recon_loss_ref(pred2, target2, mask2, loss_type)
        if not jnp.allclose(out, ref, rtol=1e-4, atol=1e-5):
            ok = False
            print(f"MISMATCH bf16 {loss_type}: kernel={out} ref={ref}")

    # Config 3: f32, full 128-wide rows divisible by the tile — exercises the
    # interior fast path (no row-validity select) end to end.
    B3, S3, D3 = 4, 64, 128
    k7, k8, k9 = jax.random.split(jax.random.PRNGKey(2), 3)
    pred3 = jax.random.normal(k7, (B3, S3, D3), dtype=jnp.float32)
    target3 = jax.random.normal(k8, (B3, S3, D3), dtype=jnp.float32)
    mask3 = (jax.random.uniform(k9, (B3, S3)) > 0.4).astype(jnp.float32)
    for loss_type in ("L1Loss", "SmoothL1Loss", "MSELoss"):
        out = jax.block_until_ready(recon_loss(pred3, target3, mask3, loss_type=loss_type))
        ref = recon_loss_ref(pred3, target3, mask3, loss_type)
        if not jnp.allclose(out, ref, rtol=1e-5, atol=1e-5):
            ok = False
            print(f"MISMATCH f32/128 {loss_type}: kernel={out} ref={ref}")

    if ok:
        print("KERNEL_OK")
</pallas_src>

<mosaic_0001>
module attributes {stable_mosaic.version = 11 : i64} {
  func.func @_recon_loss_kernel(%arg0: i32, %arg1: i32, %arg2: memref<16x32xf32, #tpu.memory_space<vmem>>, %arg3: memref<16x32xf32, #tpu.memory_space<vmem>>, %arg4: memref<16x1xf32, #tpu.memory_space<vmem>>, %arg5: memref<8x32xf32, #tpu.memory_space<vmem>>) attributes {dimension_semantics = [#tpu.dimension_semantics<parallel>, #tpu.dimension_semantics<arbitrary>], iteration_bounds = array<i64: 1, 1>, scalar_prefetch = 0 : i64, scratch_operands = 0 : i64, tpu.core_type = #tpu.core_type<tc>, window_params = [{transform_indices = @transform_0, window_bounds = array<i64: 16, 32>}, {transform_indices = @transform_1, window_bounds = array<i64: 16, 32>}, {transform_indices = @transform_2, window_bounds = array<i64: 16, 1>}, {transform_indices = @transform_3, window_bounds = array<i64: 8, 32>}]} {
    %c0_i32 = arith.constant 0 : i32
    %0 = arith.cmpi eq, %arg1, %c0_i32 : i32
    %1 = arith.extui %0 : i1 to i32
    %c0_i32_0 = arith.constant 0 : i32
    %2 = arith.cmpi ne, %1, %c0_i32_0 : i32
    scf.if %2 {
      %cst = arith.constant 0.000000e+00 : f32
      %16 = vector.broadcast %cst : f32 to vector<8x32xf32>
      %c0 = arith.constant 0 : index
      %c0_7 = arith.constant 0 : index
      %17 = vector.load %arg5[%c0, %c0_7] : memref<8x32xf32, #tpu.memory_space<vmem>>, vector<8x32xf32>
      tpu.vector_store %arg5[%c0, %c0_7], %16 {strides = array<i32>} : memref<8x32xf32, #tpu.memory_space<vmem>>, vector<8x32xf32>,
    } else {
    }
    %c1_i32 = arith.constant 1 : i32
    %3 = arith.muli %arg0, %c1_i32 : i32
    %4 = arith.addi %3, %arg1 : i32
    %c16_i32 = arith.constant 16 : i32
    %5 = arith.muli %4, %c16_i32 : i32
    %c1_i32_1 = arith.constant 1 : i32
    %6 = arith.addi %4, %c1_i32_1 : i32
    %c16_i32_2 = arith.constant 16 : i32
    %7 = arith.muli %6, %c16_i32_2 : i32
    %c16_i32_3 = arith.constant 16 : i32
    %8 = arith.cmpi sle, %7, %c16_i32_3 : i32
    %c16_i32_4 = arith.constant 16 : i32
    %9 = arith.cmpi slt, %5, %c16_i32_4 : i32
    %10 = arith.extui %8 : i1 to i32
    %c0_i32_5 = arith.constant 0 : i32
    %11 = arith.cmpi ne, %10, %c0_i32_5 : i32
    scf.if %11 {
      %c0 = arith.constant 0 : index
      %c0_7 = arith.constant 0 : index
      %16 = vector.load %arg5[%c0, %c0_7] : memref<8x32xf32, #tpu.memory_space<vmem>>, vector<8x32xf32>
      %cst = arith.constant 0.000000e+00 : f32
      %17 = vector.broadcast %cst : f32 to vector<8x32xf32>
      %cst_8 = arith.constant 0.000000e+00 : f32
      %18 = vector.broadcast %cst_8 : f32 to vector<8x32xf32>
      %c0_i32_9 = arith.constant 0 : i32
      %c16_i32_10 = arith.constant 16 : i32
      %19 = arith.muli %c0_i32_9, %c16_i32_10 : i32
      %20 = tpu.assume_multiple %19, 16 : i32
      %21 = arith.index_cast %20 : i32 to index
      %c0_11 = arith.constant 0 : index
      %22 = vector.load %arg2[%21, %c0_11] : memref<16x32xf32, #tpu.memory_space<vmem>>, vector<16x32xf32>
      %23 = arith.index_cast %20 : i32 to index
      %c0_12 = arith.constant 0 : index
      %24 = vector.load %arg3[%23, %c0_12] : memref<16x32xf32, #tpu.memory_space<vmem>>, vector<16x32xf32>
      %25 = arith.index_cast %20 : i32 to index
      %c0_13 = arith.constant 0 : index
      %26 = vector.load %arg4[%25, %c0_13] : memref<16x1xf32, #tpu.memory_space<vmem>>, vector<16x1xf32>
      %27 = arith.subf %22, %24 : vector<16x32xf32>
      %28 = vector.broadcast %26 : vector<16x1xf32> to vector<16x32xf32>
      %29 = arith.mulf %27, %28 : vector<16x32xf32>
      %30 = math.absf %29 : vector<16x32xf32>
      %31 = vector.extract_strided_slice %30 {offsets = [0, 0], sizes = [8, 32], strides = [1, 1]} : vector<16x32xf32> to vector<8x32xf32>
      %32 = vector.extract_strided_slice %30 {offsets = [8, 0], sizes = [8, 32], strides = [1, 1]} : vector<16x32xf32> to vector<8x32xf32>
      %33 = arith.addf %17, %31 : vector<8x32xf32>
      %34 = arith.addf %18, %32 : vector<8x32xf32>
      %c1_i32_14 = arith.constant 1 : i32
      %35 = arith.addf %33, %34 : vector<8x32xf32>
      %36 = arith.addf %16, %35 : vector<8x32xf32>
      %c0_15 = arith.constant 0 : index
      %c0_16 = arith.constant 0 : index
      %37 = vector.load %arg5[%c0_15, %c0_16] : memref<8x32xf32, #tpu.memory_space<vmem>>, vector<8x32xf32>
      tpu.vector_store %arg5[%c0_15, %c0_16], %36 {strides = array<i32>} : memref<8x32xf32, #tpu.memory_space<vmem>>, vector<8x32xf32>,
    } else {
    }
    %true = arith.constant true
    %12 = arith.xori %8, %true : i1
    %13 = arith.andi %12, %9 : i1
    %14 = arith.extui %13 : i1 to i32
    %c0_i32_6 = arith.constant 0 : i32
    %15 = arith.cmpi ne, %14, %c0_i32_6 : i32
    scf.if %15 {
      %c0 = arith.constant 0 : index
      %c0_7 = arith.constant 0 : index
      %16 = vector.load %arg5[%c0, %c0_7] : memref<8x32xf32, #tpu.memory_space<vmem>>, vector<8x32xf32>
      %cst = arith.constant 0.000000e+00 : f32
      %17 = vector.broadcast %cst : f32 to vector<8x32xf32>
      %cst_8 = arith.constant 0.000000e+00 : f32
      %18 = vector.broadcast %cst_8 : f32 to vector<8x32xf32>
      %c0_i32_9 = arith.constant 0 : i32
      %c16_i32_10 = arith.constant 16 : i32
      %19 = arith.muli %c0_i32_9, %c16_i32_10 : i32
      %20 = tpu.assume_multiple %19, 16 : i32
      %21 = arith.index_cast %20 : i32 to index
      %c0_11 = arith.constant 0 : index
      %22 = vector.load %arg2[%21, %c0_11] : memref<16x32xf32, #tpu.memory_space<vmem>>, vector<16x32xf32>
      %23 = arith.index_cast %20 : i32 to index
      %c0_12 = arith.constant 0 : index
      %24 = vector.load %arg3[%23, %c0_12] : memref<16x32xf32, #tpu.memory_space<vmem>>, vector<16x32xf32>
      %25 = arith.index_cast %20 : i32 to index
      %c0_13 = arith.constant 0 : index
      %26 = vector.load %arg4[%25, %c0_13] : memref<16x1xf32, #tpu.memory_space<vmem>>, vector<16x1xf32>
      %27 = arith.subf %22, %24 : vector<16x32xf32>
      %28 = vector.broadcast %26 : vector<16x1xf32> to vector<16x32xf32>
      %29 = arith.mulf %27, %28 : vector<16x32xf32>
      %30 = arith.addi %5, %20 : i32
      %31 = tpu.iota {dimensions = array<i32: 0>} : vector<16x1xi32>
      %32 = vector.broadcast %30 : i32 to vector<16x1xi32>
      %33 = arith.addi %32, %31 : vector<16x1xi32>
      %c16_i32_14 = arith.constant 16 : i32
      %34 = vector.broadcast %c16_i32_14 : i32 to vector<16x1xi32>
      %35 = arith.cmpi slt, %33, %34 : vector<16x1xi32>
      %cst_15 = arith.constant 0.000000e+00 : f32
      %36 = vector.shape_cast %35 : vector<16x1xi1> to vector<16x1xi1>
      %37 = vector.broadcast %36 : vector<16x1xi1> to vector<16x32xi1>
      %38 = vector.broadcast %cst_15 : f32 to vector<16x32xf32>
      %39 = arith.select %37, %29, %38 : vector<16x32xi1>, vector<16x32xf32>
      %40 = math.absf %39 : vector<16x32xf32>
      %41 = vector.extract_strided_slice %40 {offsets = [0, 0], sizes = [8, 32], strides = [1, 1]} : vector<16x32xf32> to vector<8x32xf32>
      %42 = vector.extract_strided_slice %40 {offsets = [8, 0], sizes = [8, 32], strides = [1, 1]} : vector<16x32xf32> to vector<8x32xf32>
      %43 = arith.addf %17, %41 : vector<8x32xf32>
      %44 = arith.addf %18, %42 : vector<8x32xf32>
      %c1_i32_16 = arith.constant 1 : i32
      %45 = arith.addf %43, %44 : vector<8x32xf32>
      %46 = arith.addf %16, %45 : vector<8x32xf32>
      %c0_17 = arith.constant 0 : index
      %c0_18 = arith.constant 0 : index
      %47 = vector.load %arg5[%c0_17, %c0_18] : memref<8x32xf32, #tpu.memory_space<vmem>>, vector<8x32xf32>
      tpu.vector_store %arg5[%c0_17, %c0_18], %46 {strides = array<i32>} : memref<8x32xf32, #tpu.memory_space<vmem>>, vector<8x32xf32>,
    } else {
    }
    return
  }
  func.func @transform_0(%arg0: i32, %arg1: i32) -> (i32, i32) {
    %c1_i32 = arith.constant 1 : i32
    %0 = arith.muli %arg0, %c1_i32 : i32
    %1 = arith.addi %0, %arg1 : i32
    %c0_i32 = arith.constant 0 : i32
    %2 = arith.minsi %1, %c0_i32 : i32
    %c0_i32_0 = arith.constant 0 : i32
    %c0_i32_1 = arith.constant 0 : i32
    return %2, %c0_i32_0 : i32, i32
  }
  func.func @transform_1(%arg0: i32, %arg1: i32) -> (i32, i32) {
    %c1_i32 = arith.constant 1 : i32
    %0 = arith.muli %arg0, %c1_i32 : i32
    %1 = arith.addi %0, %arg1 : i32
    %c0_i32 = arith.constant 0 : i32
    %2 = arith.minsi %1, %c0_i32 : i32
    %c0_i32_0 = arith.constant 0 : i32
    %c0_i32_1 = arith.constant 0 : i32
    return %2, %c0_i32_0 : i32, i32
  }
  func.func @transform_2(%arg0: i32, %arg1: i32) -> (i32, i32) {
    %c1_i32 = arith.constant 1 : i32
    %0 = arith.muli %arg0, %c1_i32 : i32
    %1 = arith.addi %0, %arg1 : i32
    %c0_i32 = arith.constant 0 : i32
    %2 = arith.minsi %1, %c0_i32 : i32
    %c0_i32_0 = arith.constant 0 : i32
    %c0_i32_1 = arith.constant 0 : i32
    return %2, %c0_i32_0 : i32, i32
  }
  func.func @transform_3(%arg0: i32, %arg1: i32) -> (i32, i32) {
    %c0_i32 = arith.constant 0 : i32
    %c0_i32_0 = arith.constant 0 : i32
    return %arg0, %c0_i32 : i32, i32
  }
}

</mosaic_0001>

<bundles_post_ra>
// kernel: tpu_custom_call.1
= control target key start
LH: loop header
LB: loop body
LE: loop exit
PB: predicated region body
PF: predicated region fallthrough
CT: control target
= control target key end

     0   :  { %8 = vsyncpa [#allocation3], 0  ;;  %s334_s0 = inlined_call_operand.vmem [shape: f32[16,32], index: 0, kind: input, shape index: {}]   ;;  %s335_s1 = inlined_call_operand.hbm [shape: f32[16,32], index: 1, kind: input, shape index: {}]   ;;  %s336_s2 = inlined_call_operand.vmem [shape: f32[16,1], index: 2, kind: input, shape index: {}]   ;;  %s337_s3 = inlined_call_operand.hbm [shape: f32[8,32], index: 3, kind: output, shape index: {}]  }
   0x1   :  { %9 = vsyncpa [#allocation4], 0  ;;  %s34_s14 = sshll.u32 %s335_s1, 4  ;;  %s288_s15 = smov [#allocation2]   ;;  %s35_s14 = int_to_ptr.hbm [resolvable:$true] %s34_s14 }
   0x2   :  { %s36_s16 = sshll.u32 %s288_s15, 4  ;;  %s289_s17 = smov 128   ;;  %s37_s16 = int_to_ptr.vmem [resolvable:$true] %s36_s16 }
   0x3   :  { %s290_s18 = smov 8  }
   0x4   :  { %42 = dma.hbm_to_vmem [thread:$0]  %s35_s14, 256, %s37_s16, [#allocation3], %s289_s17, %s289_s17, %s290_s18  }
   0x5   :  { %284 = dma.done.wait [#allocation3], 256  }
   0x6   :  { %285 = vsyncadd [#allocation3], 4294967040  ;;  %vm109_vm0 = vcmask 261120   ;;  %v291_v0 = vmov 0.0   ;;  %v292_v1 = vmov 0   ;;  %v125_v2 = vld [vmem:[%s336_s2] sm:$0xff] }
   0x7   :  { %110 = vst.msk [vmem:[#allocation5] sm:$0xff] %vm109_vm0, %v291_v0  ;;  %235 = vset.pattern.permute.xlu0 %v292_v1  ;;  %v126_v3 = vld [vmem:[%s336_s2 + $0x8] sm:$0xff]  ;;  %v121_v5 = vld [vmem:[%s334_s0] sm:$0xff]  ;;  %s293_s2 = smov [#allocation5]   ;;  %s205_s29 = sshll.u32 %s337_s3, 4  ;;  %s206_s29 = int_to_ptr.hbm [resolvable:$true] %s205_s29 }
   0x8   :  { %131 = vperm.xlu0 %235, %v125_v2   ;;  %v123_v6 = vld [vmem:[#allocation2] sm:$0xff]  ;;  %v122_v7 = vld [vmem:[%s334_s0 + $0x8] sm:$0xff]  ;;  %s203_s26 = sshll.u32 %s293_s2, 4  ;;  %s204_s26 = int_to_ptr.vmem [resolvable:$true] %s203_s26 }
   0x9   :  { %v124_v8 = vld [vmem:[#allocation2 + $0x8] sm:$0xff]  ;;  %v127_v9 = vsub.f32 %v121_v5, %v123_v6 }
   0xa   :  { %v128_v10 = vsub.f32 %v122_v7, %v124_v8 }
   0xe   :  { %v120_v16 = vld [vmem:[#allocation5] sm:$0xff] }
  0x10   :  { %136 = vperm.xlu0 %235, %v126_v3  }
  0x7a   :  { %v132_v4 = vpop.permute.xlu0 %131 }
  0x7b   :  { %v139_v11 = vmul.f32 %v132_v4, %v127_v9 }
  0x7d   :  { %v141_v14 = vand.u32 2147483647, %v139_v11 }
  0x82   :  { %v137_v12 = vpop.permute.xlu0 %136 }
  0x83   :  { %v140_v13 = vmul.f32 %v137_v12, %v128_v10 }
  0x85   :  { %v142_v15 = vand.u32 2147483647, %v140_v13 }
  0x87   :  { %v145_v17 = vadd.f32 %v142_v15, %v141_v14 }
  0x89   :  { %v146_v18 = vadd.f32 %v145_v17, %v120_v16 }
  0x8b   :  { %148 = vst.msk [vmem:[#allocation5] sm:$0xff] %vm109_vm0, %v146_v18 }
  0x8c   :  { %208 = dma.vmem_to_hbm [thread:$0]  %s204_s26, 128, %s206_s29, [#allocation4]  }
  0x8d   :  { %286 = dma.done.wait [#allocation4], 128  }
  0x8e   :  { %287 = vsyncadd [#allocation4], 4294967168 }
  0x8f   :  { %213 = vsyncpa [#allocation3], 1 }
  0x90   :  { %214 = vsyncpa [#allocation4], 1 }

</bundles_post_ra>
